<compile_context>
chip_gen: v6e
topology: v6e:2x2x1
jax: 0.10.0
libtpu: 0.0.40
codegen_flags: <defaults>
</compile_context>

<pallas_src>
import math

import jax
import jax.numpy as jnp
from jax import lax
from jax.experimental import pallas as pl
from jax.experimental.pallas import tpu as pltpu


def _pooler_kernel(x_ref, w_ref, b_ref, o_ref, acc_ref):
    """One (tb, tn) output tile; K-reduction over grid axis 2.

    x_ref : [tb, tk]   first-token activations tile
    w_ref : [tn, tk]   nn.Linear weight tile ([out, in] layout, NOT transposed)
    b_ref : [1, tn]    bias tile
    o_ref : [tb, tn]   output tile
    acc_ref: [tb, tn]  f32 VMEM accumulator (persists across K steps)
    """
    k = pl.program_id(2)

    @pl.when(k == 0)
    def _():
        acc_ref[...] = jnp.zeros_like(acc_ref)

    # y += x @ W.T  — contract last dim of both operands; feeds the MXU
    # directly with the [out, in] weight (no transpose, f32 accumulation).
    acc_ref[...] += lax.dot_general(
        x_ref[...],
        w_ref[...],
        dimension_numbers=(((1,), (1,)), ((), ())),
        preferred_element_type=jnp.float32,
    )

    @pl.when(k == pl.num_programs(2) - 1)
    def _():
        y = acc_ref[...] + b_ref[...].astype(jnp.float32)
        o_ref[...] = jnp.tanh(y).astype(o_ref.dtype)


def _round_up(n, m):
    return ((n + m - 1) // m) * m


def _largest_divisor(n, candidates):
    for c in candidates:
        if n % c == 0:
            return c
    return n


def super_bert_pooler(hidden_states, weight, bias, sample_hidden_dim):
    """Pallas implementation of SuperBertPooler.forward.

    hidden_states : [B, S, H_super]
    weight        : [H_super, H_super]  (out_dim, in_dim) — nn.Linear layout
    bias          : [H_super]
    sample_hidden_dim : static int, sampled sub-dimension (in/out_index=None path)
    """
    hs = int(sample_hidden_dim)
    B = hidden_states.shape[0]

    # Lane/sublane-dense padded shapes (128 lanes, 8 sublanes).
    hs_pad = _round_up(hs, 128)
    B_pad = _round_up(B, 8)

    # Cheap wrapper glue: first-token extraction, weight/bias sub-sampling,
    # and zero-padding to aligned shapes.  Padded x columns are zero so the
    # extra K contributions vanish; padded output rows/cols are sliced away.
    x = hidden_states[:, 0, :hs]                       # [B, hs]
    w = weight[:hs, :hs]                               # [hs, hs]  (out, in)
    b = bias[:hs]                                      # [hs]
    if B_pad != B or hs_pad != hs:
        x = jnp.pad(x, ((0, B_pad - B), (0, hs_pad - hs)))
        w = jnp.pad(w, ((0, hs_pad - hs), (0, hs_pad - hs)))
        b = jnp.pad(b, (0, hs_pad - hs))
    b = b.reshape(1, hs_pad)

    # Tile sizes: multiples of 128 (lanes) / 8 (sublanes) that divide the
    # padded dims exactly, sized to stay well under v7x's scoped VMEM with
    # double-buffered inputs.
    tb = B_pad if B_pad <= 256 else _largest_divisor(B_pad, (256, 128, 64, 32, 16, 8))
    tn = _largest_divisor(hs_pad, (512, 256, 128))
    tk = _largest_divisor(hs_pad, (1024, 512, 256, 128))

    grid = (B_pad // tb, hs_pad // tn, hs_pad // tk)

    out_pad = pl.pallas_call(
        _pooler_kernel,
        out_shape=jax.ShapeDtypeStruct((B_pad, hs_pad), hidden_states.dtype),
        grid_spec=pltpu.PrefetchScalarGridSpec(
            num_scalar_prefetch=0,
            grid=grid,
            in_specs=[
                pl.BlockSpec((tb, tk), lambda i, j, k: (i, k)),   # x
                pl.BlockSpec((tn, tk), lambda i, j, k: (j, k)),   # W ([out, in])
                pl.BlockSpec((1, tn), lambda i, j, k: (0, j)),    # bias
            ],
            out_specs=pl.BlockSpec((tb, tn), lambda i, j, k: (i, j)),
            scratch_shapes=[pltpu.VMEM((tb, tn), jnp.float32)],
        ),
        compiler_params=pltpu.CompilerParams(
            dimension_semantics=("parallel", "parallel", "arbitrary"),
        ),
    )(x, w, b)

    return out_pad[:B, :hs]


def _xavier_uniform(key, shape, dtype=jnp.float32):
    # Matches torch.nn.init.xavier_uniform_ (gain=1) for a 2-D weight.
    fan_out, fan_in = shape
    limit = math.sqrt(6.0 / (fan_in + fan_out))
    return jax.random.uniform(key, shape, dtype, minval=-limit, maxval=limit)


if __name__ == "__main__":
    key = jax.random.PRNGKey(0)
    k_x, k_w = jax.random.split(key)

    B, S, H_super = 2, 8, 64          # small shapes consistent with the module
    sample_hidden_dim = 32            # sampled sub-network hidden size

    hidden_states = jax.random.normal(k_x, (B, S, H_super), dtype=jnp.float32)
    weight = _xavier_uniform(k_w, (H_super, H_super))   # nn.Linear weight [out, in]
    bias = jnp.zeros((H_super,), dtype=jnp.float32)     # nn.init.constant_(bias, 0.0)

    out = super_bert_pooler(hidden_states, weight, bias, sample_hidden_dim)
    out = jax.block_until_ready(out)

    # Reference check in plain JAX (same math as F.linear + tanh).
    ref = jnp.tanh(
        hidden_states[:, 0, :sample_hidden_dim]
        @ weight[:sample_hidden_dim, :sample_hidden_dim].T
        + bias[:sample_hidden_dim]
    )
    assert out.shape == (B, sample_hidden_dim)
    assert jnp.allclose(out, ref, atol=1e-5, rtol=1e-5)

    print("KERNEL_OK")
</pallas_src>

<mosaic_0001>
module attributes {stable_mosaic.version = 11 : i64} {
  func.func @_pooler_kernel(%arg0: i32, %arg1: i32, %arg2: i32, %arg3: memref<8x128xf32, #tpu.memory_space<vmem>>, %arg4: memref<128x128xf32, #tpu.memory_space<vmem>>, %arg5: memref<1x128xf32, #tpu.memory_space<vmem>>, %arg6: memref<8x128xf32, #tpu.memory_space<vmem>>, %arg7: memref<8x128xf32, #tpu.memory_space<vmem>>) attributes {dimension_semantics = [#tpu.dimension_semantics<parallel>, #tpu.dimension_semantics<parallel>, #tpu.dimension_semantics<arbitrary>], iteration_bounds = array<i64: 1, 1, 1>, scalar_prefetch = 0 : i64, scratch_operands = 1 : i64, tpu.core_type = #tpu.core_type<tc>, window_params = [{transform_indices = @transform_0, window_bounds = array<i64: 8, 128>}, {transform_indices = @transform_1, window_bounds = array<i64: 128, 128>}, {transform_indices = @transform_2, window_bounds = array<i64: 1, 128>}, {transform_indices = @transform_3, window_bounds = array<i64: 8, 128>}]} {
    %c0_i32 = arith.constant 0 : i32
    %0 = arith.cmpi eq, %arg2, %c0_i32 : i32
    %1 = arith.extui %0 : i1 to i32
    %c0_i32_0 = arith.constant 0 : i32
    %2 = arith.cmpi ne, %1, %c0_i32_0 : i32
    scf.if %2 {
      %cst_10 = arith.constant 0.000000e+00 : f32
      %12 = vector.broadcast %cst_10 : f32 to vector<8x128xf32>
      %c0_11 = arith.constant 0 : index
      %c0_12 = arith.constant 0 : index
      %13 = vector.load %arg7[%c0_11, %c0_12] : memref<8x128xf32, #tpu.memory_space<vmem>>, vector<8x128xf32>
      tpu.vector_store %arg7[%c0_11, %c0_12], %12 {strides = array<i32>} : memref<8x128xf32, #tpu.memory_space<vmem>>, vector<8x128xf32>,
    } else {
    }
    %c0 = arith.constant 0 : index
    %c0_1 = arith.constant 0 : index
    %3 = vector.load %arg7[%c0, %c0_1] : memref<8x128xf32, #tpu.memory_space<vmem>>, vector<8x128xf32>
    %c0_2 = arith.constant 0 : index
    %c0_3 = arith.constant 0 : index
    %4 = vector.load %arg3[%c0_2, %c0_3] : memref<8x128xf32, #tpu.memory_space<vmem>>, vector<8x128xf32>
    %c0_4 = arith.constant 0 : index
    %c0_5 = arith.constant 0 : index
    %5 = vector.load %arg4[%c0_4, %c0_5] : memref<128x128xf32, #tpu.memory_space<vmem>>, vector<128x128xf32>
    %cst = arith.constant dense<0.000000e+00> : vector<8x128xf32>
    %6 = tpu.matmul %4, %5, %cst {dimension_numbers = #tpu.dot_dimension_numbers<[1], [1], [0], [0], [0, 0, 1, 0], [], []>} : vector<8x128xf32>, vector<128x128xf32>, vector<8x128xf32> -> vector<8x128xf32>
    %7 = arith.addf %3, %6 : vector<8x128xf32>
    %c0_6 = arith.constant 0 : index
    %c0_7 = arith.constant 0 : index
    %8 = vector.load %arg7[%c0_6, %c0_7] : memref<8x128xf32, #tpu.memory_space<vmem>>, vector<8x128xf32>
    tpu.vector_store %arg7[%c0_6, %c0_7], %7 {strides = array<i32>} : memref<8x128xf32, #tpu.memory_space<vmem>>, vector<8x128xf32>,
    %c0_i32_8 = arith.constant 0 : i32
    %9 = arith.cmpi eq, %arg2, %c0_i32_8 : i32
    %10 = arith.extui %9 : i1 to i32
    %c0_i32_9 = arith.constant 0 : i32
    %11 = arith.cmpi ne, %10, %c0_i32_9 : i32
    scf.if %11 {
      %c0_10 = arith.constant 0 : index
      %c0_11 = arith.constant 0 : index
      %12 = vector.load %arg7[%c0_10, %c0_11] : memref<8x128xf32, #tpu.memory_space<vmem>>, vector<8x128xf32>
      %c0_12 = arith.constant 0 : index
      %c0_13 = arith.constant 0 : index
      %13 = vector.load %arg5[%c0_12, %c0_13] : memref<1x128xf32, #tpu.memory_space<vmem>>, vector<1x128xf32>
      %14 = vector.broadcast %13 : vector<1x128xf32> to vector<8x128xf32>
      %15 = arith.addf %12, %14 : vector<8x128xf32>
      %16 = math.tanh %15 : vector<8x128xf32>
      %c0_14 = arith.constant 0 : index
      %c0_15 = arith.constant 0 : index
      %17 = vector.load %arg6[%c0_14, %c0_15] : memref<8x128xf32, #tpu.memory_space<vmem>>, vector<8x128xf32>
      tpu.vector_store %arg6[%c0_14, %c0_15], %16 {strides = array<i32>} : memref<8x128xf32, #tpu.memory_space<vmem>>, vector<8x128xf32>,
    } else {
    }
    return
  }
  func.func @transform_0(%arg0: i32, %arg1: i32, %arg2: i32) -> (i32, i32) {
    %c0_i32 = arith.constant 0 : i32
    return %arg0, %arg2 : i32, i32
  }
  func.func @transform_1(%arg0: i32, %arg1: i32, %arg2: i32) -> (i32, i32) {
    %c0_i32 = arith.constant 0 : i32
    return %arg1, %arg2 : i32, i32
  }
  func.func @transform_2(%arg0: i32, %arg1: i32, %arg2: i32) -> (i32, i32) {
    %c0_i32 = arith.constant 0 : i32
    %c0_i32_0 = arith.constant 0 : i32
    return %c0_i32, %arg1 : i32, i32
  }
  func.func @transform_3(%arg0: i32, %arg1: i32, %arg2: i32) -> (i32, i32) {
    %c0_i32 = arith.constant 0 : i32
    return %arg0, %arg1 : i32, i32
  }
}

</mosaic_0001>

<bundles_post_ra>
// kernel: tpu_custom_call.1
= control target key start
LH: loop header
LB: loop body
LE: loop exit
PB: predicated region body
PF: predicated region fallthrough
CT: control target
= control target key end

     0   :  { %8 = vsyncpa [#allocation4], 0  ;;  %s333_s0 = inlined_call_operand.hbm [shape: f32[8,128], index: 0, kind: input, shape index: {}]   ;;  %s334_s1 = inlined_call_operand.hbm [shape: f32[128,128], index: 1, kind: input, shape index: {}]   ;;  %s335_s2 = inlined_call_operand.vmem [shape: f32[1,128], index: 2, kind: input, shape index: {}]   ;;  %s336_s3 = inlined_call_operand.hbm [shape: f32[8,128], index: 3, kind: output, shape index: {}]  }
   0x1   :  { %9 = vsyncpa [#allocation7], 0 }
   0x2   :  { %10 = vsyncpa [#allocation5], 0  ;;  %s294_s12 = smov [#allocation3]   ;;  %s295_s14 = smov [#allocation6]  }
   0x3   :  { %s17_s13 = sshll.u32 %s294_s12, 4  ;;  %s26_s15 = sshll.u32 %s295_s14, 4  ;;  %s18_s13 = int_to_ptr.vmem [resolvable:$true] %s17_s13  ;;  %s27_s15 = int_to_ptr.vmem [resolvable:$true] %s26_s15 }
   0x4   :  { %s236_s16 = scalar_lea.vmem %s18_s13, 128  ;;  %p241_p1 = scmp.lt.s32.totalorder %s18_s13, %s18_s13 }
   0x5   :  { %p237_p0 = scmp.ne.s32.totalorder %s18_s13, %s236_s16  ;;  %p242_p2 = scmp.lt.s32.totalorder %s236_s16, %s236_s16 }
   0x7   :  { %p243_p3 = por %p242_p2, %p241_p1 }
   0x9   :  { %p244_p4 = pnand %p243_p3, %p237_p0 }
   0xb   :  { %247 = shalt.err (!%p244_p4)
}
   0xc   :  { %20 = dma.hbm_to_vmem [thread:$0]  %s333_s0, 128, %s18_s13, [#allocation4]  }
   0xd   :  { %s256_s19 = scalar_lea.vmem %s27_s15, 2048  ;;  %p261_p6 = scmp.lt.s32.totalorder %s27_s15, %s27_s15 }
   0xe   :  { %p257_p5 = scmp.ne.s32.totalorder %s27_s15, %s256_s19  ;;  %p262_p7 = scmp.lt.s32.totalorder %s256_s19, %s256_s19 }
  0x10   :  { %p263_p8 = por %p262_p7, %p261_p6 }
  0x12   :  { %p264_p9 = pnand %p263_p8, %p257_p5 }
  0x14   :  { %267 = shalt.err (!%p264_p9)
}
  0x15   :  { %s296_s20 = smov 128   ;;  %s297_s21 = smov 8  }
  0x16   :  { %32 = dma.hbm_to_vmem [thread:$0]  %s334_s1, 2048, %s27_s15, [#allocation7], %s296_s20, %s296_s20, %s297_s21  }
  0x17   :  { %288 = dma.done.wait [#allocation4], 128  }
  0x18   :  { %289 = vsyncadd [#allocation4], 4294967168 }
  0x19   :  { %290 = dma.done.wait [#allocation7], 2048  }
  0x1a   :  { %291 = vsyncadd [#allocation7], 4294965248  ;;  %v298_v0 = vmov 0.0   ;;  %vm299_vm0 = vmmov 0   ;;  %v63_v1 = vld [vmem:[#allocation6 + $0x78] sm:$0xff]  ;;  %v62_v2 = vld [vmem:[#allocation6 + $0x70] sm:$0xff] }
  0x1b   :  { %184 = vmatprep.subr.mxu0 %v298_v0  ;;  %216 = vmatprep.mubr.msk.f32.mxu0 %vm299_vm0, %v298_v0  ;;  %v61_v3 = vld [vmem:[#allocation6 + $0x68] sm:$0xff]  ;;  %v60_v4 = vld [vmem:[#allocation6 + $0x60] sm:$0xff]  ;;  %v59_v5 = vld [vmem:[#allocation6 + $0x58] sm:$0xff]  ;;  %s300_s24 = smov [#allocation8]  }
  0x1c   :  { %185 = vmatpush3.xpose.msra.mxu0 %v63_v1  ;;  %v58_v6 = vld [vmem:[#allocation6 + $0x50] sm:$0xff]  ;;  %v57_v7 = vld [vmem:[#allocation6 + $0x48] sm:$0xff]  ;;  %v56_v8 = vld [vmem:[#allocation6 + $0x40] sm:$0xff]  ;;  %s156_s25 = sshll.u32 %s300_s24, 4  ;;  %s157_s25 = int_to_ptr.vmem [resolvable:$true] %s156_s25 }
  0x1d   :  { %186 = vmatprep.subr.mxu0 %v298_v0  ;;  %v55_v9 = vld [vmem:[#allocation6 + $0x38] sm:$0xff]  ;;  %v54_v10 = vld [vmem:[#allocation6 + $0x30] sm:$0xff]  ;;  %v53_v11 = vld [vmem:[#allocation6 + $0x28] sm:$0xff]  ;;  %s268_s26 = scalar_lea.vmem %s157_s25, 128  ;;  %p273_p11 = scmp.lt.s32.totalorder %s157_s25, %s157_s25 }
  0x1e   :  { %v52_v12 = vld [vmem:[#allocation6 + $0x20] sm:$0xff]  ;;  %v51_v13 = vld [vmem:[#allocation6 + $0x18] sm:$0xff]  ;;  %v50_v14 = vld [vmem:[#allocation6 + $0x10] sm:$0xff]  ;;  %p269_p10 = scmp.ne.s32.totalorder %s157_s25, %s268_s26  ;;  %p274_p12 = scmp.lt.s32.totalorder %s268_s26, %s268_s26 }
  0x1f   :  { %v49_v15 = vld [vmem:[#allocation6 + $0x8] sm:$0xff]  ;;  %v48_v16 = vld [vmem:[#allocation6] sm:$0xff]  ;;  %v47_v17 = vld [vmem:[#allocation3] sm:$0xff] }
  0x20   :  { %187 = vmatpush3.xpose.msra.mxu0 %v62_v2  ;;  %v166_v18 = vld [vmem:[%s335_s2] ss:$0 sm:$0xff]  ;;  %p275_p13 = por %p274_p12, %p273_p11 }
  0x21   :  { %188 = vmatprep.subr.mxu0 %v298_v0 }
  0x22   :  { %p276_p0 = pnand %p275_p13, %p269_p10 }
  0x24   :  { %189 = vmatpush3.xpose.msra.mxu0 %v61_v3 }
  0x25   :  { %190 = vmatprep.subr.mxu0 %v298_v0 }
  0x28   :  { %191 = vmatpush3.xpose.msra.mxu0 %v60_v4 }
  0x29   :  { %192 = vmatprep.subr.mxu0 %v298_v0 }
  0x2c   :  { %193 = vmatpush3.xpose.msra.mxu0 %v59_v5 }
  0x2d   :  { %194 = vmatprep.subr.mxu0 %v298_v0 }
  0x30   :  { %195 = vmatpush3.xpose.msra.mxu0 %v58_v6 }
  0x31   :  { %196 = vmatprep.subr.mxu0 %v298_v0 }
  0x34   :  { %197 = vmatpush3.xpose.msra.mxu0 %v57_v7 }
  0x35   :  { %198 = vmatprep.subr.mxu0 %v298_v0 }
  0x38   :  { %199 = vmatpush3.xpose.msra.mxu0 %v56_v8 }
  0x39   :  { %200 = vmatprep.subr.mxu0 %v298_v0 }
  0x3c   :  { %201 = vmatpush3.xpose.msra.mxu0 %v55_v9 }
  0x3d   :  { %202 = vmatprep.subr.mxu0 %v298_v0 }
  0x40   :  { %203 = vmatpush3.xpose.msra.mxu0 %v54_v10 }
  0x41   :  { %204 = vmatprep.subr.mxu0 %v298_v0 }
  0x44   :  { %205 = vmatpush3.xpose.msra.mxu0 %v53_v11 }
  0x45   :  { %206 = vmatprep.subr.mxu0 %v298_v0 }
  0x48   :  { %207 = vmatpush3.xpose.msra.mxu0 %v52_v12 }
  0x49   :  { %208 = vmatprep.subr.mxu0 %v298_v0 }
  0x4c   :  { %209 = vmatpush3.xpose.msra.mxu0 %v51_v13 }
  0x4d   :  { %210 = vmatprep.subr.mxu0 %v298_v0 }
  0x50   :  { %211 = vmatpush3.xpose.msra.mxu0 %v50_v14 }
  0x51   :  { %212 = vmatprep.subr.mxu0 %v298_v0 }
  0x54   :  { %213 = vmatpush3.xpose.msra.mxu0 %v49_v15 }
  0x55   :  { %214 = vmatprep.subr.mxu0 %v298_v0 }
  0x58   :  { %215 = vmatpush3.xpose.msra.mxu0 %v48_v16 }
  0x5b   :  { %217 = vmatmul.mubr.f32.vlgmr.msra.gmra.mxu0 %v47_v17 }
 0x11b   :  { %v130_v19 = vpop.f32.mrf.mxu0 }
 0x11c   :  { %v147_v20 = vadd.f32 %v166_v18, %v130_v19 }
 0x11d   :  { %v218_v21 = vpop.f32.mrf.mxu0 }
 0x11e   :  { %226 = vtanh.f32 %v147_v20 }
 0x12b   :  { %v227_v22 = vpop.eup %226 }
 0x12c   :  { %149 = vst [vmem:[#allocation8] sm:$0xff] %v227_v22 }
 0x12d   :  { %279 = shalt.err (!%p276_p0)
}
 0x12e   :  { %159 = dma.vmem_to_hbm [thread:$0]  %s157_s25, 128, %s336_s3, [#allocation5]  }
 0x12f   :  { %292 = dma.done.wait [#allocation5], 128  }
 0x130   :  { %293 = vsyncadd [#allocation5], 4294967168 }
 0x131   :  { %163 = vsyncpa [#allocation4], 1 }
 0x132   :  { %164 = vsyncpa [#allocation7], 1 }
 0x133   :  { %165 = vsyncpa [#allocation5], 1 }

</bundles_post_ra>
